<compile_context>
chip_gen: v6e
topology: v6e:2x2x1
jax: 0.10.0
libtpu: 0.0.40
codegen_flags: <defaults>
</compile_context>

<pallas_src>
import math

import jax
import jax.numpy as jnp
from jax.experimental import pallas as pl
from jax.experimental.pallas import tpu as pltpu

_LANES = 128
_WIDE_C = 2048                      # max lane-dense width
_TILE_BYTE_BUDGET = 4 * 1024 * 1024  # per input tile (input-dtype bytes)

_C1 = math.sqrt(2.0 / math.pi)
_C2 = _C1 * 0.044715


def _gelu_kernel(x_ref, o_ref):
    x = x_ref[...].astype(jnp.float32)
    # 0.5*x*(1 + tanh(sqrt(2/pi)*(x + 0.044715*x^3)))
    #   = (0.5*x) * (1 + tanh(x*(C1 + C2*x*x)))        (7 VALU ops + 1 EUP)
    inner = x * (jnp.float32(_C1) + jnp.float32(_C2) * (x * x))
    y = (jnp.float32(0.5) * x) * (jnp.float32(1.0) + jnp.tanh(inner))
    o_ref[...] = y.astype(o_ref.dtype)


def _round_up(a: int, b: int) -> int:
    return pl.cdiv(a, b) * b


def gelu_pallas(x: jax.Array) -> jax.Array:
    """Tanh-approx GELU (same formula as the PyTorch module) via Pallas."""
    orig_shape = x.shape
    dtype = x.dtype
    total = int(x.size)
    if total == 0:
        return x

    itemsize = jnp.dtype(dtype).itemsize
    sublane = max(8, 32 // itemsize)  # 8 for f32, 16 for bf16, 32 for int8/fp8

    # Largest multiple of 128 (<= 2048) that divides `total` -> zero-copy
    # reshape and unmasked lane-dense stores.  Fallback 128 for ragged totals.
    c_dim = _LANES
    for cand in range(_WIDE_C, _LANES - 1, -_LANES):
        if total % cand == 0:
            c_dim = cand
            break

    rows = pl.cdiv(total, c_dim)
    padded_total = rows * c_dim

    flat = x.reshape(-1)
    if padded_total != total:
        # Truly ragged tail (< 128 elements): minimal pad.  GELU(0) = 0 and
        # the padding is sliced off after the call.
        flat = jnp.pad(flat, (0, padded_total - total))
    x2d = flat.reshape(rows, c_dim)

    # Row tile from the byte budget, rounded down to a sublane multiple.
    budget_rows = max(
        sublane,
        (_TILE_BYTE_BUDGET // (c_dim * itemsize)) // sublane * sublane,
    )

    if rows >= 2 * sublane:
        # At least 2 balanced grid steps (keeps both v7x TensorCores busy),
        # more when a single budget tile can't cover the rows.
        n_tiles = max(2, pl.cdiv(rows, budget_rows))
        tile_m = min(_round_up(pl.cdiv(rows, n_tiles), sublane), budget_rows)
        grid = (pl.cdiv(rows, tile_m),)  # ragged last block is masked by Pallas
    else:
        tile_m = rows  # block == full dim -> always a legal block shape
        grid = (1,)

    cost = pl.CostEstimate(
        flops=8 * padded_total,            # 7 VALU ops + final cast, per elem
        transcendentals=padded_total,      # one tanh per element
        bytes_accessed=2 * padded_total * itemsize,
    )

    out2d = pl.pallas_call(
        _gelu_kernel,
        out_shape=jax.ShapeDtypeStruct((rows, c_dim), dtype),
        grid_spec=pltpu.PrefetchScalarGridSpec(
            num_scalar_prefetch=0,
            grid=grid,
            in_specs=[pl.BlockSpec((tile_m, c_dim), lambda i: (i, 0))],
            out_specs=pl.BlockSpec((tile_m, c_dim), lambda i: (i, 0)),
        ),
        compiler_params=pltpu.CompilerParams(
            dimension_semantics=("parallel",),
            vmem_limit_bytes=32 * 1024 * 1024,
        ),
        cost_estimate=cost,
    )(x2d)

    if padded_total != total:
        return out2d.reshape(-1)[:total].reshape(orig_shape)
    return out2d.reshape(orig_shape)


def gelu_reference(x: jax.Array) -> jax.Array:
    xf = x.astype(jnp.float32)
    c = jnp.float32(math.sqrt(2.0 / math.pi))
    y = 0.5 * xf * (1.0 + jnp.tanh(c * (xf + 0.044715 * xf**3)))
    return y.astype(x.dtype)


if __name__ == "__main__":
    key = jax.random.PRNGKey(0)

    # Small FFNN-style activation: zero-copy path, single full-dim block.
    x_small = jax.random.normal(key, (2, 8, 32), dtype=jnp.float32)
    y_small = gelu_pallas(x_small)
    jax.block_until_ready(y_small)
    assert y_small.shape == x_small.shape and y_small.dtype == x_small.dtype
    assert jnp.allclose(y_small, gelu_reference(x_small), atol=1e-5, rtol=1e-5)

    # Non-2048-divisible hidden dim: adaptive lane width (1920), 2-step ragged grid.
    x_big = jax.random.normal(jax.random.PRNGKey(1), (2, 64, 3000),
                              dtype=jnp.float32)
    y_big = gelu_pallas(x_big)
    jax.block_until_ready(y_big)
    assert y_big.shape == x_big.shape and y_big.dtype == x_big.dtype
    assert jnp.allclose(y_big, gelu_reference(x_big), atol=1e-5, rtol=1e-5)

    # Truly ragged element count: minimal tail pad fallback.
    x_rag = jax.random.normal(jax.random.PRNGKey(2), (3, 5, 7),
                              dtype=jnp.float32)
    y_rag = gelu_pallas(x_rag)
    jax.block_until_ready(y_rag)
    assert y_rag.shape == x_rag.shape and y_rag.dtype == x_rag.dtype
    assert jnp.allclose(y_rag, gelu_reference(x_rag), atol=1e-5, rtol=1e-5)

    # bf16: dtype-aware sublane rounding, f32 compute inside the kernel.
    x_bf = jax.random.normal(jax.random.PRNGKey(3), (4, 16, 160),
                             dtype=jnp.bfloat16)
    y_bf = gelu_pallas(x_bf)
    jax.block_until_ready(y_bf)
    assert y_bf.shape == x_bf.shape and y_bf.dtype == x_bf.dtype
    assert jnp.allclose(y_bf.astype(jnp.float32),
                        gelu_reference(x_bf).astype(jnp.float32),
                        atol=2e-2, rtol=2e-2)

    print("KERNEL_OK")
</pallas_src>

<mosaic_0001>
module attributes {stable_mosaic.version = 11 : i64} {
  func.func @_gelu_kernel(%arg0: i32, %arg1: memref<1x512xf32, #tpu.memory_space<vmem>>, %arg2: memref<1x512xf32, #tpu.memory_space<vmem>>) attributes {dimension_semantics = [#tpu.dimension_semantics<parallel>], iteration_bounds = array<i64: 1>, scalar_prefetch = 0 : i64, scratch_operands = 0 : i64, tpu.core_type = #tpu.core_type<tc>, window_params = [{transform_indices = @transform_0, window_bounds = array<i64: 1, 512>}, {transform_indices = @transform_1, window_bounds = array<i64: 1, 512>}]} {
    %c0 = arith.constant 0 : index
    %c0_0 = arith.constant 0 : index
    %0 = vector.load %arg1[%c0, %c0_0] : memref<1x512xf32, #tpu.memory_space<vmem>>, vector<1x512xf32>
    %1 = arith.mulf %0, %0 : vector<1x512xf32>
    %cst = arith.constant 0.0356774069 : f32
    %2 = vector.broadcast %cst : f32 to vector<1x512xf32>
    %3 = arith.mulf %2, %1 : vector<1x512xf32>
    %cst_1 = arith.constant 0.797884583 : f32
    %4 = vector.broadcast %cst_1 : f32 to vector<1x512xf32>
    %5 = arith.addf %4, %3 : vector<1x512xf32>
    %6 = arith.mulf %0, %5 : vector<1x512xf32>
    %cst_2 = arith.constant 5.000000e-01 : f32
    %7 = vector.broadcast %cst_2 : f32 to vector<1x512xf32>
    %8 = arith.mulf %7, %0 : vector<1x512xf32>
    %9 = math.tanh %6 : vector<1x512xf32>
    %cst_3 = arith.constant 1.000000e+00 : f32
    %10 = vector.broadcast %cst_3 : f32 to vector<1x512xf32>
    %11 = arith.addf %10, %9 : vector<1x512xf32>
    %12 = arith.mulf %8, %11 : vector<1x512xf32>
    %c0_4 = arith.constant 0 : index
    %c0_5 = arith.constant 0 : index
    %13 = vector.load %arg2[%c0_4, %c0_5] : memref<1x512xf32, #tpu.memory_space<vmem>>, vector<1x512xf32>
    tpu.vector_store %arg2[%c0_4, %c0_5], %12 {strides = array<i32>} : memref<1x512xf32, #tpu.memory_space<vmem>>, vector<1x512xf32>,
    return
  }
  func.func @transform_0(%arg0: i32) -> (i32, i32) {
    %c0_i32 = arith.constant 0 : i32
    %c0_i32_0 = arith.constant 0 : i32
    return %arg0, %c0_i32 : i32, i32
  }
  func.func @transform_1(%arg0: i32) -> (i32, i32) {
    %c0_i32 = arith.constant 0 : i32
    %c0_i32_0 = arith.constant 0 : i32
    return %arg0, %c0_i32 : i32, i32
  }
}

</mosaic_0001>

<bundles_post_ra>
// kernel: tpu_custom_call.1
= control target key start
LH: loop header
LB: loop body
LE: loop exit
PB: predicated region body
PF: predicated region fallthrough
CT: control target
= control target key end

     0   :  { %6 = vsyncpa [#allocation3], 0  ;;  %s116_s0 = inlined_call_operand.hbm [shape: f32[1,512], index: 0, kind: input, shape index: {}]   ;;  %s117_s1 = inlined_call_operand.hbm [shape: f32[1,512], index: 1, kind: output, shape index: {}]  }
   0x1   :  { %7 = vsyncpa [#allocation4], 0  ;;  %s98_s6 = smov [#allocation2]  }
   0x2   :  { %s14_s7 = sshll.u32 %s98_s6, 4  ;;  %s15_s7 = int_to_ptr.vmem [resolvable:$true] %s14_s7 }
   0x3   :  { %s62_s8 = scalar_lea.vmem %s15_s7, 64  ;;  %p67_p1 = scmp.lt.s32.totalorder %s15_s7, %s15_s7 }
   0x4   :  { %p63_p0 = scmp.ne.s32.totalorder %s15_s7, %s62_s8  ;;  %p68_p2 = scmp.lt.s32.totalorder %s62_s8, %s62_s8 }
   0x6   :  { %p69_p3 = por %p68_p2, %p67_p1 }
   0x8   :  { %p70_p4 = pnand %p69_p3, %p63_p0 }
   0xa   :  { %73 = shalt.err (!%p70_p4)
}
   0xb   :  { %17 = dma.hbm_to_vmem [thread:$0]  %s116_s0, 64, %s15_s7, [#allocation3]  }
   0xc   :  { %94 = dma.done.wait [#allocation3], 64  }
   0xd   :  { %95 = vsyncadd [#allocation3], 4294967232  ;;  %v21_v0 = vld [vmem:[#allocation2] sm:$0xf]  ;;  %v30_v5 = vlaneseq  ;;  %s99_s11 = smov [#allocation5]  }
   0xe   :  { %v22_v1 = vmul.f32 %v21_v0, %v21_v0  ;;  %v26_v6 = vmul.f32 0.5, %v21_v0  ;;  %s41_s12 = sshll.u32 %s99_s11, 4  ;;  %s42_s12 = int_to_ptr.vmem [resolvable:$true] %s41_s12 }
   0xf   :  { %vm32_vm0 = vcmp.lt.s32.totalorder %v30_v5, 512  ;;  %s74_s13 = scalar_lea.vmem %s42_s12, 64  ;;  %p79_p6 = scmp.lt.s32.totalorder %s42_s12, %s42_s12 }
  0x10   :  { %v23_v2 = vmul.f32 0.035677407, %v22_v1  ;;  %p75_p5 = scmp.ne.s32.totalorder %s42_s12, %s74_s13  ;;  %p80_p7 = scmp.lt.s32.totalorder %s74_s13, %s74_s13 }
  0x12   :  { %v24_v3 = vadd.f32 0.7978846, %v23_v2  ;;  %p81_p8 = por %p80_p7, %p79_p6 }
  0x14   :  { %v25_v4 = vmul.f32 %v24_v3, %v21_v0  ;;  %p82_p9 = pnand %p81_p8, %p75_p5 }
  0x16   :  { %52 = vtanh.f32 %v25_v4 }
  0x23   :  { %v53_v7 = vpop.eup %52 }
  0x24   :  { %v28_v8 = vadd.f32 1.0, %v53_v7 }
  0x26   :  { %v29_v9 = vmul.f32 %v28_v8, %v26_v6 }
  0x28   :  { %34 = vst.msk [vmem:[#allocation5] sm:$0xf] %vm32_vm0, %v29_v9 }
  0x29   :  { %85 = shalt.err (!%p82_p9)
}
  0x2a   :  { %44 = dma.vmem_to_hbm [thread:$0]  %s42_s12, 64, %s117_s1, [#allocation4]  }
  0x2b   :  { %96 = dma.done.wait [#allocation4], 64  }
  0x2c   :  { %97 = vsyncadd [#allocation4], 4294967232 }
  0x2d   :  { %48 = vsyncpa [#allocation3], 1 }
  0x2e   :  { %49 = vsyncpa [#allocation4], 1 }

</bundles_post_ra>
